<compile_context>
chip_gen: v6e
topology: v6e:2x2x1
jax: 0.10.0
libtpu: 0.0.40
codegen_flags: <defaults>
</compile_context>

<pallas_src>
import functools

import jax
import jax.numpy as jnp
from jax.experimental import pallas as pl
from jax.experimental.pallas import tpu as pltpu

H_DIM = 10  # hidden units of fc1


def mlp_kernel(x_ref, w1_ref, b1_ref, w2_ref, b2_ref, o_ref):
    # x_ref: (2, TN) VMEM, batch on lanes.  o_ref: (1, TN) VMEM.
    # w1_ref: (20,) SMEM  (PyTorch (10,2) row-major: w1[h*2 + c])
    # b1_ref: (10,) SMEM, w2_ref: (10,) SMEM, b2_ref: (1,) SMEM.
    x0 = x_ref[0:1, :]                      # (1, TN)
    x1 = x_ref[1:2, :]                      # (1, TN)

    acc = jnp.zeros_like(x0) + b2_ref[0]    # output accumulator, starts at b2

    # Fully unrolled: 10 hidden units as scalar-broadcast mul-adds (VPU) + tanh (EUP).
    for h in range(H_DIM):
        pre = w1_ref[2 * h + 0] * x0 + w1_ref[2 * h + 1] * x1 + b1_ref[h]
        acc = acc + w2_ref[h] * jnp.tanh(pre)

    o_ref[...] = acc                        # lane-dense, unmasked store


def _round_up(x, m):
    return (x + m - 1) // m * m


def _jnp_ref(x, w1, b1, w2, b2):
    return jnp.tanh(x @ w1.T + b1) @ w2.T + b2


@functools.partial(jax.jit, static_argnames=("tn",))
def residual_net_forward(x, w1, b1, w2, b2, *, tn=512):
    """Forward pass.

    x : (N, 2) f32 (PyTorch "NC" layout).
    Params in native PyTorch layouts: w1 (10, 2), b1 (10,), w2 (1, 10), b2 (1,).
    Returns (N, 1) f32.
    """
    n = x.shape[0]

    # Tiny batches: kernel-launch + per-step overhead dwarfs ~60 FLOPs/row; use XLA.
    if n < 128:
        return _jnp_ref(x, w1, b1, w2, b2)

    tn = int(min(tn, _round_up(n, 128)))    # lane tile, multiple of 128
    n_pad = _round_up(n, tn)

    # Wrapper-side layout plumbing: batch onto lanes, zero-pad to tile multiple.
    xt = jnp.pad(x.T, ((0, 0), (0, n_pad - n)))          # (2, n_pad)

    out = pl.pallas_call(
        mlp_kernel,
        out_shape=jax.ShapeDtypeStruct((1, n_pad), jnp.float32),
        grid=(n_pad // tn,),
        in_specs=[
            pl.BlockSpec((2, tn), lambda i: (0, i)),                    # x tile (VMEM)
            pl.BlockSpec(memory_space=pltpu.MemorySpace.SMEM),          # w1 flat (20,)
            pl.BlockSpec(memory_space=pltpu.MemorySpace.SMEM),          # b1 (10,)
            pl.BlockSpec(memory_space=pltpu.MemorySpace.SMEM),          # w2 flat (10,)
            pl.BlockSpec(memory_space=pltpu.MemorySpace.SMEM),          # b2 (1,)
        ],
        out_specs=pl.BlockSpec((1, tn), lambda i: (0, i)),
        compiler_params=pltpu.CompilerParams(
            dimension_semantics=("parallel",),       # shard N across TCs on v7x
            vmem_limit_bytes=32 * 1024 * 1024,       # far above actual few-KB footprint
        ),
    )(xt, w1.reshape(-1), b1.reshape(-1), w2.reshape(-1), b2.reshape(-1))

    return out[0, :n][:, None]                        # (N, 1)


def init_params(key):
    """Deterministic init matching PyTorch nn.Linear defaults
    (U(-1/sqrt(fan_in), 1/sqrt(fan_in))), stored in native PyTorch layouts."""
    k1, k2, k3, k4 = jax.random.split(key, 4)
    bound1 = 1.0 / jnp.sqrt(2.0)     # fc1 fan_in = 2
    bound2 = 1.0 / jnp.sqrt(10.0)    # fc2 fan_in = 10
    w1 = jax.random.uniform(k1, (10, 2), jnp.float32, -bound1, bound1)
    b1 = jax.random.uniform(k2, (10,), jnp.float32, -bound1, bound1)
    w2 = jax.random.uniform(k3, (1, 10), jnp.float32, -bound2, bound2)
    b2 = jax.random.uniform(k4, (1,), jnp.float32, -bound2, bound2)
    return w1, b1, w2, b2


if __name__ == "__main__":
    key = jax.random.PRNGKey(0)
    k_x, k_p = jax.random.split(key)

    # N large enough to exercise the tiled Pallas path (2 grid steps at TN=512).
    n = 1024
    x = jax.random.normal(k_x, (n, 2), jnp.float32)
    w1, b1, w2, b2 = init_params(k_p)

    out = residual_net_forward(x, w1, b1, w2, b2)
    out = jax.block_until_ready(out)

    ref = _jnp_ref(x, w1, b1, w2, b2)
    assert out.shape == (n, 1)
    assert jnp.allclose(out, ref, atol=1e-5, rtol=1e-5), float(jnp.max(jnp.abs(out - ref)))

    print("KERNEL_OK")
</pallas_src>

<mosaic_0001>
module attributes {stable_mosaic.version = 11 : i64} {
  func.func @mlp_kernel(%arg0: i32, %arg1: memref<2x512xf32, #tpu.memory_space<vmem>>, %arg2: memref<20xf32, #tpu.memory_space<smem>>, %arg3: memref<10xf32, #tpu.memory_space<smem>>, %arg4: memref<10xf32, #tpu.memory_space<smem>>, %arg5: memref<1xf32, #tpu.memory_space<smem>>, %arg6: memref<1x512xf32, #tpu.memory_space<vmem>>) attributes {dimension_semantics = [#tpu.dimension_semantics<parallel>], iteration_bounds = array<i64: 2>, scalar_prefetch = 0 : i64, scratch_operands = 0 : i64, tpu.core_type = #tpu.core_type<tc>, window_params = [{transform_indices = @transform_0, window_bounds = array<i64: 2, 512>}, {transform_indices = @transform_1, window_bounds = array<i64: 20>}, {transform_indices = @transform_2, window_bounds = array<i64: 10>}, {transform_indices = @transform_3, window_bounds = array<i64: 10>}, {transform_indices = @transform_4, window_bounds = array<i64: 1>}, {transform_indices = @transform_5, window_bounds = array<i64: 1, 512>}]} {
    %c0 = arith.constant 0 : index
    %c0_0 = arith.constant 0 : index
    %0 = vector.load %arg1[%c0, %c0_0] : memref<2x512xf32, #tpu.memory_space<vmem>>, vector<1x512xf32>
    %c1 = arith.constant 1 : index
    %c0_1 = arith.constant 0 : index
    %1 = vector.load %arg1[%c1, %c0_1] : memref<2x512xf32, #tpu.memory_space<vmem>>, vector<1x512xf32>
    %cst = arith.constant 0.000000e+00 : f32
    %2 = vector.broadcast %cst : f32 to vector<1x512xf32>
    %c0_2 = arith.constant 0 : index
    %3 = memref.load %arg5[%c0_2] : memref<1xf32, #tpu.memory_space<smem>>
    %4 = vector.broadcast %3 : f32 to vector<1x512xf32>
    %5 = arith.addf %2, %4 : vector<1x512xf32>
    %c0_3 = arith.constant 0 : index
    %6 = memref.load %arg2[%c0_3] : memref<20xf32, #tpu.memory_space<smem>>
    %7 = vector.broadcast %6 : f32 to vector<1x512xf32>
    %8 = arith.mulf %7, %0 : vector<1x512xf32>
    %c1_4 = arith.constant 1 : index
    %9 = memref.load %arg2[%c1_4] : memref<20xf32, #tpu.memory_space<smem>>
    %10 = vector.broadcast %9 : f32 to vector<1x512xf32>
    %11 = arith.mulf %10, %1 : vector<1x512xf32>
    %12 = arith.addf %8, %11 : vector<1x512xf32>
    %c0_5 = arith.constant 0 : index
    %13 = memref.load %arg3[%c0_5] : memref<10xf32, #tpu.memory_space<smem>>
    %14 = vector.broadcast %13 : f32 to vector<1x512xf32>
    %15 = arith.addf %12, %14 : vector<1x512xf32>
    %c0_6 = arith.constant 0 : index
    %16 = memref.load %arg4[%c0_6] : memref<10xf32, #tpu.memory_space<smem>>
    %17 = math.tanh %15 : vector<1x512xf32>
    %18 = vector.broadcast %16 : f32 to vector<1x512xf32>
    %19 = arith.mulf %18, %17 : vector<1x512xf32>
    %20 = arith.addf %5, %19 : vector<1x512xf32>
    %c2 = arith.constant 2 : index
    %21 = memref.load %arg2[%c2] : memref<20xf32, #tpu.memory_space<smem>>
    %22 = vector.broadcast %21 : f32 to vector<1x512xf32>
    %23 = arith.mulf %22, %0 : vector<1x512xf32>
    %c3 = arith.constant 3 : index
    %24 = memref.load %arg2[%c3] : memref<20xf32, #tpu.memory_space<smem>>
    %25 = vector.broadcast %24 : f32 to vector<1x512xf32>
    %26 = arith.mulf %25, %1 : vector<1x512xf32>
    %27 = arith.addf %23, %26 : vector<1x512xf32>
    %c1_7 = arith.constant 1 : index
    %28 = memref.load %arg3[%c1_7] : memref<10xf32, #tpu.memory_space<smem>>
    %29 = vector.broadcast %28 : f32 to vector<1x512xf32>
    %30 = arith.addf %27, %29 : vector<1x512xf32>
    %c1_8 = arith.constant 1 : index
    %31 = memref.load %arg4[%c1_8] : memref<10xf32, #tpu.memory_space<smem>>
    %32 = math.tanh %30 : vector<1x512xf32>
    %33 = vector.broadcast %31 : f32 to vector<1x512xf32>
    %34 = arith.mulf %33, %32 : vector<1x512xf32>
    %35 = arith.addf %20, %34 : vector<1x512xf32>
    %c4 = arith.constant 4 : index
    %36 = memref.load %arg2[%c4] : memref<20xf32, #tpu.memory_space<smem>>
    %37 = vector.broadcast %36 : f32 to vector<1x512xf32>
    %38 = arith.mulf %37, %0 : vector<1x512xf32>
    %c5 = arith.constant 5 : index
    %39 = memref.load %arg2[%c5] : memref<20xf32, #tpu.memory_space<smem>>
    %40 = vector.broadcast %39 : f32 to vector<1x512xf32>
    %41 = arith.mulf %40, %1 : vector<1x512xf32>
    %42 = arith.addf %38, %41 : vector<1x512xf32>
    %c2_9 = arith.constant 2 : index
    %43 = memref.load %arg3[%c2_9] : memref<10xf32, #tpu.memory_space<smem>>
    %44 = vector.broadcast %43 : f32 to vector<1x512xf32>
    %45 = arith.addf %42, %44 : vector<1x512xf32>
    %c2_10 = arith.constant 2 : index
    %46 = memref.load %arg4[%c2_10] : memref<10xf32, #tpu.memory_space<smem>>
    %47 = math.tanh %45 : vector<1x512xf32>
    %48 = vector.broadcast %46 : f32 to vector<1x512xf32>
    %49 = arith.mulf %48, %47 : vector<1x512xf32>
    %50 = arith.addf %35, %49 : vector<1x512xf32>
    %c6 = arith.constant 6 : index
    %51 = memref.load %arg2[%c6] : memref<20xf32, #tpu.memory_space<smem>>
    %52 = vector.broadcast %51 : f32 to vector<1x512xf32>
    %53 = arith.mulf %52, %0 : vector<1x512xf32>
    %c7 = arith.constant 7 : index
    %54 = memref.load %arg2[%c7] : memref<20xf32, #tpu.memory_space<smem>>
    %55 = vector.broadcast %54 : f32 to vector<1x512xf32>
    %56 = arith.mulf %55, %1 : vector<1x512xf32>
    %57 = arith.addf %53, %56 : vector<1x512xf32>
    %c3_11 = arith.constant 3 : index
    %58 = memref.load %arg3[%c3_11] : memref<10xf32, #tpu.memory_space<smem>>
    %59 = vector.broadcast %58 : f32 to vector<1x512xf32>
    %60 = arith.addf %57, %59 : vector<1x512xf32>
    %c3_12 = arith.constant 3 : index
    %61 = memref.load %arg4[%c3_12] : memref<10xf32, #tpu.memory_space<smem>>
    %62 = math.tanh %60 : vector<1x512xf32>
    %63 = vector.broadcast %61 : f32 to vector<1x512xf32>
    %64 = arith.mulf %63, %62 : vector<1x512xf32>
    %65 = arith.addf %50, %64 : vector<1x512xf32>
    %c8 = arith.constant 8 : index
    %66 = memref.load %arg2[%c8] : memref<20xf32, #tpu.memory_space<smem>>
    %67 = vector.broadcast %66 : f32 to vector<1x512xf32>
    %68 = arith.mulf %67, %0 : vector<1x512xf32>
    %c9 = arith.constant 9 : index
    %69 = memref.load %arg2[%c9] : memref<20xf32, #tpu.memory_space<smem>>
    %70 = vector.broadcast %69 : f32 to vector<1x512xf32>
    %71 = arith.mulf %70, %1 : vector<1x512xf32>
    %72 = arith.addf %68, %71 : vector<1x512xf32>
    %c4_13 = arith.constant 4 : index
    %73 = memref.load %arg3[%c4_13] : memref<10xf32, #tpu.memory_space<smem>>
    %74 = vector.broadcast %73 : f32 to vector<1x512xf32>
    %75 = arith.addf %72, %74 : vector<1x512xf32>
    %c4_14 = arith.constant 4 : index
    %76 = memref.load %arg4[%c4_14] : memref<10xf32, #tpu.memory_space<smem>>
    %77 = math.tanh %75 : vector<1x512xf32>
    %78 = vector.broadcast %76 : f32 to vector<1x512xf32>
    %79 = arith.mulf %78, %77 : vector<1x512xf32>
    %80 = arith.addf %65, %79 : vector<1x512xf32>
    %c10 = arith.constant 10 : index
    %81 = memref.load %arg2[%c10] : memref<20xf32, #tpu.memory_space<smem>>
    %82 = vector.broadcast %81 : f32 to vector<1x512xf32>
    %83 = arith.mulf %82, %0 : vector<1x512xf32>
    %c11 = arith.constant 11 : index
    %84 = memref.load %arg2[%c11] : memref<20xf32, #tpu.memory_space<smem>>
    %85 = vector.broadcast %84 : f32 to vector<1x512xf32>
    %86 = arith.mulf %85, %1 : vector<1x512xf32>
    %87 = arith.addf %83, %86 : vector<1x512xf32>
    %c5_15 = arith.constant 5 : index
    %88 = memref.load %arg3[%c5_15] : memref<10xf32, #tpu.memory_space<smem>>
    %89 = vector.broadcast %88 : f32 to vector<1x512xf32>
    %90 = arith.addf %87, %89 : vector<1x512xf32>
    %c5_16 = arith.constant 5 : index
    %91 = memref.load %arg4[%c5_16] : memref<10xf32, #tpu.memory_space<smem>>
    %92 = math.tanh %90 : vector<1x512xf32>
    %93 = vector.broadcast %91 : f32 to vector<1x512xf32>
    %94 = arith.mulf %93, %92 : vector<1x512xf32>
    %95 = arith.addf %80, %94 : vector<1x512xf32>
    %c12 = arith.constant 12 : index
    %96 = memref.load %arg2[%c12] : memref<20xf32, #tpu.memory_space<smem>>
    %97 = vector.broadcast %96 : f32 to vector<1x512xf32>
    %98 = arith.mulf %97, %0 : vector<1x512xf32>
    %c13 = arith.constant 13 : index
    %99 = memref.load %arg2[%c13] : memref<20xf32, #tpu.memory_space<smem>>
    %100 = vector.broadcast %99 : f32 to vector<1x512xf32>
    %101 = arith.mulf %100, %1 : vector<1x512xf32>
    %102 = arith.addf %98, %101 : vector<1x512xf32>
    %c6_17 = arith.constant 6 : index
    %103 = memref.load %arg3[%c6_17] : memref<10xf32, #tpu.memory_space<smem>>
    %104 = vector.broadcast %103 : f32 to vector<1x512xf32>
    %105 = arith.addf %102, %104 : vector<1x512xf32>
    %c6_18 = arith.constant 6 : index
    %106 = memref.load %arg4[%c6_18] : memref<10xf32, #tpu.memory_space<smem>>
    %107 = math.tanh %105 : vector<1x512xf32>
    %108 = vector.broadcast %106 : f32 to vector<1x512xf32>
    %109 = arith.mulf %108, %107 : vector<1x512xf32>
    %110 = arith.addf %95, %109 : vector<1x512xf32>
    %c14 = arith.constant 14 : index
    %111 = memref.load %arg2[%c14] : memref<20xf32, #tpu.memory_space<smem>>
    %112 = vector.broadcast %111 : f32 to vector<1x512xf32>
    %113 = arith.mulf %112, %0 : vector<1x512xf32>
    %c15 = arith.constant 15 : index
    %114 = memref.load %arg2[%c15] : memref<20xf32, #tpu.memory_space<smem>>
    %115 = vector.broadcast %114 : f32 to vector<1x512xf32>
    %116 = arith.mulf %115, %1 : vector<1x512xf32>
    %117 = arith.addf %113, %116 : vector<1x512xf32>
    %c7_19 = arith.constant 7 : index
    %118 = memref.load %arg3[%c7_19] : memref<10xf32, #tpu.memory_space<smem>>
    %119 = vector.broadcast %118 : f32 to vector<1x512xf32>
    %120 = arith.addf %117, %119 : vector<1x512xf32>
    %c7_20 = arith.constant 7 : index
    %121 = memref.load %arg4[%c7_20] : memref<10xf32, #tpu.memory_space<smem>>
    %122 = math.tanh %120 : vector<1x512xf32>
    %123 = vector.broadcast %121 : f32 to vector<1x512xf32>
    %124 = arith.mulf %123, %122 : vector<1x512xf32>
    %125 = arith.addf %110, %124 : vector<1x512xf32>
    %c16 = arith.constant 16 : index
    %126 = memref.load %arg2[%c16] : memref<20xf32, #tpu.memory_space<smem>>
    %127 = vector.broadcast %126 : f32 to vector<1x512xf32>
    %128 = arith.mulf %127, %0 : vector<1x512xf32>
    %c17 = arith.constant 17 : index
    %129 = memref.load %arg2[%c17] : memref<20xf32, #tpu.memory_space<smem>>
    %130 = vector.broadcast %129 : f32 to vector<1x512xf32>
    %131 = arith.mulf %130, %1 : vector<1x512xf32>
    %132 = arith.addf %128, %131 : vector<1x512xf32>
    %c8_21 = arith.constant 8 : index
    %133 = memref.load %arg3[%c8_21] : memref<10xf32, #tpu.memory_space<smem>>
    %134 = vector.broadcast %133 : f32 to vector<1x512xf32>
    %135 = arith.addf %132, %134 : vector<1x512xf32>
    %c8_22 = arith.constant 8 : index
    %136 = memref.load %arg4[%c8_22] : memref<10xf32, #tpu.memory_space<smem>>
    %137 = math.tanh %135 : vector<1x512xf32>
    %138 = vector.broadcast %136 : f32 to vector<1x512xf32>
    %139 = arith.mulf %138, %137 : vector<1x512xf32>
    %140 = arith.addf %125, %139 : vector<1x512xf32>
    %c18 = arith.constant 18 : index
    %141 = memref.load %arg2[%c18] : memref<20xf32, #tpu.memory_space<smem>>
    %142 = vector.broadcast %141 : f32 to vector<1x512xf32>
    %143 = arith.mulf %142, %0 : vector<1x512xf32>
    %c19 = arith.constant 19 : index
    %144 = memref.load %arg2[%c19] : memref<20xf32, #tpu.memory_space<smem>>
    %145 = vector.broadcast %144 : f32 to vector<1x512xf32>
    %146 = arith.mulf %145, %1 : vector<1x512xf32>
    %147 = arith.addf %143, %146 : vector<1x512xf32>
    %c9_23 = arith.constant 9 : index
    %148 = memref.load %arg3[%c9_23] : memref<10xf32, #tpu.memory_space<smem>>
    %149 = vector.broadcast %148 : f32 to vector<1x512xf32>
    %150 = arith.addf %147, %149 : vector<1x512xf32>
    %c9_24 = arith.constant 9 : index
    %151 = memref.load %arg4[%c9_24] : memref<10xf32, #tpu.memory_space<smem>>
    %152 = math.tanh %150 : vector<1x512xf32>
    %153 = vector.broadcast %151 : f32 to vector<1x512xf32>
    %154 = arith.mulf %153, %152 : vector<1x512xf32>
    %155 = arith.addf %140, %154 : vector<1x512xf32>
    %c0_25 = arith.constant 0 : index
    %c0_26 = arith.constant 0 : index
    %156 = vector.load %arg6[%c0_25, %c0_26] : memref<1x512xf32, #tpu.memory_space<vmem>>, vector<1x512xf32>
    tpu.vector_store %arg6[%c0_25, %c0_26], %155 {strides = array<i32>} : memref<1x512xf32, #tpu.memory_space<vmem>>, vector<1x512xf32>,
    return
  }
  func.func @transform_0(%arg0: i32) -> (i32, i32) {
    %c0_i32 = arith.constant 0 : i32
    %c0_i32_0 = arith.constant 0 : i32
    return %c0_i32, %arg0 : i32, i32
  }
  func.func @transform_1(%arg0: i32) -> i32 {
    %c0_i32 = arith.constant 0 : i32
    %c0_i32_0 = arith.constant 0 : i32
    return %c0_i32 : i32
  }
  func.func @transform_2(%arg0: i32) -> i32 {
    %c0_i32 = arith.constant 0 : i32
    %c0_i32_0 = arith.constant 0 : i32
    return %c0_i32 : i32
  }
  func.func @transform_3(%arg0: i32) -> i32 {
    %c0_i32 = arith.constant 0 : i32
    %c0_i32_0 = arith.constant 0 : i32
    return %c0_i32 : i32
  }
  func.func @transform_4(%arg0: i32) -> i32 {
    %c0_i32 = arith.constant 0 : i32
    %c0_i32_0 = arith.constant 0 : i32
    return %c0_i32 : i32
  }
  func.func @transform_5(%arg0: i32) -> (i32, i32) {
    %c0_i32 = arith.constant 0 : i32
    %c0_i32_0 = arith.constant 0 : i32
    return %c0_i32, %arg0 : i32, i32
  }
}

</mosaic_0001>

<bundles_post_ra>
// kernel: residual_net_forward.1
= control target key start
LH: loop header
LB: loop body
LE: loop exit
PB: predicated region body
PF: predicated region fallthrough
CT: control target
= control target key end

     0   :  { %s1033_s0 = inlined_call_operand.vmem [shape: f32[2,1024], index: 0, kind: input, shape index: {}]   ;;  %s1034_s1 = inlined_call_operand.vmem [shape: f32[20], index: 1, kind: input, shape index: {}]   ;;  %s1035_s2 = inlined_call_operand.vmem [shape: f32[10], index: 2, kind: input, shape index: {}]   ;;  %s1036_s3 = inlined_call_operand.vmem [shape: f32[10], index: 3, kind: input, shape index: {}]   ;;  %s1037_s4 = inlined_call_operand.<no memory space> [shape: f32[1], index: 4, kind: input, shape index: {}]   ;;  %s1038_s5 = inlined_call_operand.hbm [shape: f32[1,1024], index: 5, kind: output, shape index: {}]  }
   0x1   :  { %10 = sst [smem:[#allocation2]] %s1037_s4 }
   0x2   :  { %11 = vsyncpa [#allocation5], 0 }
   0x3   :  { %12 = vsyncpa [#allocation7], 0 }
   0x4   :  { %13 = vsyncpa [#allocation4], 0 }
   0x5   :  { %15 = vsyncpa [#allocation4 + $0x1], 0  ;;  %s831_s20 = smov 0   ;;  %s833_s21 = smov 0  }
   0x6   :  { %s835_s22 = smov 0   ;;  %s837_s23 = smov 0  }
   0x7 LB: > { %s852_s4 = sadd.s32 4294967295, %s792_s23   ;;  %s532_s24 = sadd.s32 4294967294, %s792_s23   ;;  %s792_s23 = sphi %s837_s23, %s1056_s23   ;;  %s788_s22 = sphi %s835_s22, %s1055_s22   ;;  %s784_s21 = sphi %s833_s21, %s1054_s21   ;;  %s780_s20 = sphi %s831_s20, %s1053_s20  }
   0x8   : > { %s856_s25 = sadd.s32 1, %s792_s23   ;;  %s138_s26 = sadd.s32 1, %s788_s22 }
   0x9   : > { %s135_s27 = ssub.s32 %s792_s23, %s856_s25  ;;  %p148_p0 = scmp.ne.s32.totalorder %s788_s22, %s784_s21 }
   0xa   : > { %p136_p1 = scmp.eq.s32.totalorder %s135_s27, 0  ;;  %p149_p2 = scmp.eq.s32.totalorder %s852_s4, 1 }
   0xb   : > { %p154_p3 = scmp.ne.s32.totalorder %s784_s21, %s780_s20  ;;  %p155_p4 = scmp.eq.s32.totalorder %s532_s24, 1 }
   0xc   : > { %s867_s28 = scalar_select %p136_p1, %s788_s22, %s138_s26  }
   0xd   : > { %p869_p5 = por %p149_p2, %p148_p0  ;;  %p873_p6 = por %p155_p4, %p154_p3 }
   0xe   : > { %p533_p7 = scmp.ge.s32.totalorder %s792_s23, 1  ;;  %p162_p8 = scmp.lt.s32.totalorder %s792_s23, 3 }
   0xf   : > { %s1042_s29 = scalar_select %p869_p5, 1, 0 }
  0x10   : > { %s1043_s30 = scalar_select %p873_p6, 1, 0 }
  0x11   : > { %p1039_p9 = scmp.eq.s32.totalorder %s852_s4, 0  ;;  %p880_p10 = pnand %p533_p7, %p162_p8 }
  0x12   : > { %s186_s9 = sshll.u32 %s1035_s2, 4  ;;  %s175_s12 = sshll.u32 %s1034_s1, 4  ;;  %s187_s9 = int_to_ptr.vmem [resolvable:$true] %s186_s9  ;;  %s176_s12 = int_to_ptr.vmem [resolvable:$true] %s175_s12 }
  0x13   : > { %s1044_s6 = scalar_select %p880_p10, 1, 0 }
  0x14   : > { %p603_p11 = pneg %p880_p10  ;;  %s197_s16 = sshll.u32 %s1036_s3, 4  ;;  %s901_s16 = int_to_ptr.vmem [resolvable:$true] %s197_s16 }
  0x15   : > { %s679_s17 = scalar_lea.vmem %s187_s9, 16  ;;  %p687_p3 = scmp.lt.s32.totalorder %s187_s9, %s187_s9 }
  0x16   : > { %p894_p12 = pnand %p1039_p9, %p603_p11  ;;  %p680_p13 = scmp.ne.s32.totalorder %s187_s9, %s679_s17 }
  0x17   : > { %p688_p4 = scmp.lt.s32.totalorder %s679_s17, %s679_s17 }
  0x18   : > { %p681_p0 = pneg %p894_p12 }
  0x19   : > { %p689_p7 = por %p688_p4, %p687_p3 }
  0x1a   : > { %p682_p1 = pnand %p681_p0, %p680_p13 }
  0x1c   : > { %p683_p2 = pneg %p682_p1 }
  0x1e   : > { %p690_p8 = pnand %p689_p7, %p683_p2 }
  0x20   : > { %693 = shalt.err (!%p690_p8)
}
  0x21   : > { %s794_s18 = smov [#allocation6]   ;;  %s694_s19 = scalar_lea.vmem %s176_s12, 16 }
  0x22   : > { %609 = dma.vmem_to_smem (!%p894_p12), %s187_s9, 16, %s794_s18, [#allocation7]  }
  0x23   : > { %p695_p11 = scmp.ne.s32.totalorder %s176_s12, %s694_s19  ;;  %p702_p5 = scmp.lt.s32.totalorder %s176_s12, %s176_s12 }
  0x24   : > { %p703_p10 = scmp.lt.s32.totalorder %s694_s19, %s694_s19 }
  0x25   : > { %p697_p9 = pnand %p695_p11, %p681_p0 }
  0x26   : > { %p704_p13 = por %p703_p10, %p702_p5 }
  0x27   : > { %p698_p6 = pneg %p697_p9 }
  0x29   : > { %p705_p1 = pnand %p704_p13, %p698_p6 }
  0x2b   : > { %708 = shalt.err (!%p705_p1)
}
  0x2c   : > { %s795_s24 = smov [#allocation3]   ;;  %s709_s26 = scalar_lea.vmem %s901_s16, 16 }
  0x2d   : > { %606 = dma.vmem_to_smem (!%p894_p12), %s176_s12, 16, %s795_s24, [#allocation5]  }
  0x2e   : > { %p710_p2 = scmp.ne.s32.totalorder %s901_s16, %s709_s26  ;;  %p717_p9 = scmp.lt.s32.totalorder %s901_s16, %s901_s16 }
  0x2f   : > { %p718_p7 = scmp.lt.s32.totalorder %s709_s26, %s709_s26 }
  0x30   : > { %p712_p3 = pnand %p710_p2, %p681_p0 }
  0x31   : > { %p719_p5 = por %p718_p7, %p717_p9 }
  0x32   : > { %p713_p4 = pneg %p712_p3 }
  0x34   : > { %p720_p6 = pnand %p719_p5, %p713_p4 }
  0x36   : > { %723 = shalt.err (!%p720_p6)
}
  0x37   : > { %s796_s27 = smov [#allocation8]   ;;  %p1046_p10 = scmp.ne.s32.totalorder %s1044_s6, 0 }
  0x38   : > { %612 = dma.vmem_to_smem (!%p894_p12), %s901_s16, 16, %s796_s27, [#allocation7]  }
  0x39   : > { %222 = sbr.rel (%p1046_p10) target bundleno = 149 (0x95), region = 40  ;;  %p1047_p8 = scmp.eq.s32.totalorder (!%p1046_p10), %s852_s4, 0 }
  0x3e   : > { %767 = dma.done.wait (%p1047_p8), [#allocation5], 16   ;;  %p1048_p0 = pmov %p1047_p8 }
  0x40   : > { %769 = vsyncadd (%p1048_p0), [#allocation5], 4294967280  ;;  %p1049_p11 = pmov %p1048_p0 }
  0x41   : > { %p1050_p13 = pmov %p1048_p0 }
  0x42   : > { %771 = dma.done.wait (%p1049_p11), [#allocation7], 32  }
  0x43   : > { %773 = vsyncadd (%p1050_p13), [#allocation7], 4294967264 }
  0x44   : > { %236 = sfence }
  0x45   : > { %s543_s7 = sshll.u32 %s852_s4, 2  ;;  %s272_s8 = sld [smem:[#allocation3]] }
  0x46   : > { %p260_p1 = scmp.lt.s32.totalorder %s543_s7, 7  ;;  %s546_s9 = sld [smem:[#allocation3 + $0x1]] }
  0x47   : > { %s279_s13 = sld [smem:[#allocation6]]  ;;  %p1051_p2 = scmp.ne.s32.totalorder %s1042_s29, 0 }
  0x48   : > { %s1058_s7 = smov (!%p260_p1, %s543_s7), 7  ;;  %s547_s14 = sld [smem:[#allocation3 + $0x2]] }
  0x49   : > { %s544_s6 = sshll.u32 %s1058_s7, 1  ;;  %s548_s15 = sld [smem:[#allocation3 + $0x3]] }
  0x4a   : > { %s263_s12 = scalar_lea.vmem %s1033_s0, %s544_s6  ;;  %s549_s16 = sld [smem:[#allocation6 + $0x1]] }
  0x4b   : > { %v939_v0 = vld [vmem:[%s263_s12] ss:$2 sm:$0xf]  ;;  %v941_v1 = vld [vmem:[%s263_s12 + $0x1] ss:$2 sm:$0xf]  ;;  %v273_v2 = vstv %s272_s8 }
  0x4c   : > { %v274_v3 = vmul.f32 %v273_v2, %v939_v0  ;;  %v276_v4 = vstv %s546_s9  ;;  %s551_s17 = sld [smem:[#allocation3 + $0x4]] }
  0x4d   : > { %v277_v5 = vmul.f32 %v941_v1, %v276_v4  ;;  %v280_v6 = vstv %s279_s13  ;;  %s552_s18 = sld [smem:[#allocation3 + $0x5]] }
  0x4e   : > { %v288_v8 = vstv %s547_s14  ;;  %s553_s19 = sld [smem:[#allocation6 + $0x2]] }
  0x4f   : > { %v278_v7 = vadd.f32 %v277_v5, %v274_v3  ;;  %s945_s24 = sld [smem:[#allocation2]]  ;;  %v289_v10 = vmul.f32 %v288_v8, %v939_v0  ;;  %v291_v11 = vstv %s548_s15 }
  0x50   : > { %v292_v12 = vmul.f32 %v941_v1, %v291_v11  ;;  %s555_s26 = sld [smem:[#allocation3 + $0x6]]  ;;  %v295_v13 = vstv %s549_s16 }
  0x51   : > { %v281_v9 = vadd.f32 %v280_v6, %v278_v7  ;;  %s556_s27 = sld [smem:[#allocation3 + $0x7]] }
  0x52   : > { %v293_v14 = vadd.f32 %v292_v12, %v289_v10  ;;  %v303_v15 = vstv %s551_s17  ;;  %s557_s7 = sld [smem:[#allocation6 + $0x3]] }
  0x53   : > { %659 = vtanh.f32 %v281_v9  ;;  %s949_s8 = sld [smem:[#allocation8]]  ;;  %v304_v16 = vmul.f32 %v303_v15, %v939_v0  ;;  %v306_v17 = vstv %s552_s18 }
  0x54   : > { %v296_v18 = vadd.f32 %v295_v13, %v293_v14  ;;  %v307_v19 = vmul.f32 %v941_v1, %v306_v17  ;;  %s559_s6 = sld [smem:[#allocation3 + $0x8]]  ;;  %v310_v20 = vstv %s553_s19 }
  0x55   : > { %s560_s9 = sld [smem:[#allocation3 + $0x9]]  ;;  %v270_v39 = vstv %s945_s24 }
  0x56   : > { %661 = vtanh.f32 %v296_v18  ;;  %v308_v21 = vadd.f32 %v307_v19, %v304_v16  ;;  %v318_v22 = vstv %s555_s26  ;;  %s953_s10 = sld [smem:[#allocation6 + $0x4]] }
  0x57   : > { %s955_s11 = sld [smem:[#allocation8 + $0x1]]  ;;  %v319_v23 = vmul.f32 %v318_v22, %v939_v0  ;;  %v321_v24 = vstv %s556_s27 }
  0x58   : > { %v311_v25 = vadd.f32 %v310_v20, %v308_v21  ;;  %v322_v26 = vmul.f32 %v941_v1, %v321_v24  ;;  %s563_s12 = sld [smem:[#allocation3 + $0xa]]  ;;  %v325_v27 = vstv %s557_s7 }
  0x59   : > { %s564_s13 = sld [smem:[#allocation3 + $0xb]]  ;;  %v284_v32 = vstv %s949_s8 }
  0x5a   : > { %663 = vtanh.f32 %v311_v25  ;;  %v323_v28 = vadd.f32 %v322_v26, %v319_v23  ;;  %v333_v29 = vstv %s559_s6  ;;  %s959_s14 = sld [smem:[#allocation6 + $0x5]] }
  0x5b   : > { %s961_s15 = sld [smem:[#allocation8 + $0x2]]  ;;  %v334_v30 = vmul.f32 %v333_v29, %v939_v0  ;;  %v336_v31 = vstv %s560_s9 }
  0x5c   : > { %v326_v33 = vadd.f32 %v325_v27, %v323_v28  ;;  %v337_v34 = vmul.f32 %v941_v1, %v336_v31  ;;  %s567_s16 = sld [smem:[#allocation3 + $0xc]]  ;;  %v340_v35 = vstv %s953_s10 }
  0x5d   : > { %s568_s17 = sld [smem:[#allocation3 + $0xd]]  ;;  %v299_v45 = vstv %s955_s11 }
  0x5e   : > { %665 = vtanh.f32 %v326_v33  ;;  %v338_v37 = vadd.f32 %v337_v34, %v334_v30  ;;  %v348_v38 = vstv %s563_s12  ;;  %s967_s18 = sld [smem:[#allocation6 + $0x6]] }
  0x5f   : > { %s970_s19 = sld [smem:[#allocation8 + $0x3]]  ;;  %v349_v41 = vmul.f32 %v348_v38, %v939_v0  ;;  %v351_v42 = vstv %s564_s13 }
  0x60   : > { %v660_v36 = vpop.eup %659  ;;  %v341_v43 = vadd.f32 %v340_v35, %v338_v37  ;;  %v352_v44 = vmul.f32 %v941_v1, %v351_v42  ;;  %s571_s26 = sld [smem:[#allocation3 + $0xe]]  ;;  %v355_v46 = vstv %s959_s14 }
  0x61   : > { %v285_v40 = vmul.f32 %v660_v36, %v284_v32  ;;  %s572_s27 = sld [smem:[#allocation3 + $0xf]]  ;;  %v314_v56 = vstv %s961_s15 }
  0x62   : > { %667 = vtanh.f32 %v341_v43  ;;  %v353_v48 = vadd.f32 %v352_v44, %v349_v41  ;;  %v363_v49 = vstv %s567_s16  ;;  %s976_s24 = sld [smem:[#allocation6 + $0x7]] }
  0x63   : > { %v286_v47 = vadd.f32 %v285_v40, %v270_v39  ;;  %v662_v50 = vpop.eup %661  ;;  %s978_s7 = sld [smem:[#allocation8 + $0x4]]  ;;  %v364_v51 = vmul.f32 %v363_v49, %v939_v0  ;;  %v366_v52 = vstv %s568_s17 }
  0x64   : > { %v300_v53 = vmul.f32 %v662_v50, %v299_v45  ;;  %v356_v54 = vadd.f32 %v355_v46, %v353_v48  ;;  %v367_v55 = vmul.f32 %v941_v1, %v366_v52  ;;  %s575_s8 = sld [smem:[#allocation3 + $0x10]]  ;;  %v370_v57 = vstv %s967_s18  ;;  %s256_s18 = sand.u32 1, %s784_s21  }
  0x65   : > { %s576_s6 = sld [smem:[#allocation3 + $0x11]]  ;;  %v329_v5 = vstv %s970_s19  ;;  %s542_s19 = sshll.u32 %s256_s18, 2  ;;  %v422_v45 = vlaneseq }
  0x66   : > { %v301_v58 = vadd.f32 %v300_v53, %v286_v47  ;;  %669 = vtanh.f32 %v356_v54  ;;  %v368_v59 = vadd.f32 %v367_v55, %v364_v51  ;;  %v378_v60 = vstv %s571_s26  ;;  %s984_s9 = sld [smem:[#allocation6 + $0x8]]  ;;  %s588_s26 = sshll.u32 %s852_s4, 6 }
  0x67   : > { %v664_v61 = vpop.eup %663  ;;  %s986_s10 = sld [smem:[#allocation8 + $0x5]]  ;;  %v379_v62 = vmul.f32 %v378_v60, %v939_v0  ;;  %v381_v63 = vstv %s572_s27  ;;  %s258_s27 = scalar_lea.vmem [#allocation9], %s542_s19  ;;  %vm424_vm0 = vcmp.lt.s32.totalorder %v422_v45, 512 }
  0x68   : > { %v315_v2 = vmul.f32 %v664_v61, %v314_v56  ;;  %v371_v3 = vadd.f32 %v370_v57, %v368_v59  ;;  %v382_v4 = vmul.f32 %v941_v1, %v381_v63  ;;  %s579_s11 = sld [smem:[#allocation3 + $0x12]]  ;;  %v385_v6 = vstv %s976_s24  ;;  %s442_s24 = sshll.u32 %s258_s27, 4  ;;  %s443_s24 = int_to_ptr.vmem [resolvable:$true] %s442_s24 }
  0x69   : > { %s580_s12 = sld [smem:[#allocation3 + $0x13]]  ;;  %v344_v16 = vstv %s978_s7 }
  0x6a   : > { %v316_v7 = vadd.f32 %v315_v2, %v301_v58  ;;  %671 = vtanh.f32 %v371_v3  ;;  %v383_v8 = vadd.f32 %v382_v4, %v379_v62  ;;  %v393_v9 = vstv %s575_s8  ;;  %s581_s13 = sld [smem:[#allocation6 + $0x9]] }
  0x6b   : > { %v666_v10 = vpop.eup %665  ;;  %v394_v11 = vmul.f32 %v393_v9, %v939_v0  ;;  %v396_v12 = vstv %s576_s6  ;;  %s570_s14 = sld [smem:[#allocation8 + $0x6]]  ;;  %s440_s6 = scalar_lea.hbm %s1038_s5, %s588_s26 }
  0x6c   : > { %v330_v13 = vmul.f32 %v666_v10, %v329_v5  ;;  %v386_v14 = vadd.f32 %v385_v6, %v383_v8  ;;  %v397_v15 = vmul.f32 %v941_v1, %v396_v12  ;;  %v400_v17 = vstv %s984_s9  ;;  %s574_s15 = sld [smem:[#allocation8 + $0x7]]  ;;  %s428_s9 = scalar_lea.sflag [#allocation4], %s256_s18 }
  0x6d   : > { %v359_v27 = vstv %s986_s10  ;;  %s578_s16 = sld [smem:[#allocation8 + $0x8]]  ;;  %s724_s10 = scalar_lea.vmem %s443_s24, 64 }
  0x6e   : > { %v331_v18 = vadd.f32 %v330_v13, %v316_v7  ;;  %673 = vtanh.f32 %v386_v14  ;;  %v398_v19 = vadd.f32 %v397_v15, %v394_v11  ;;  %v408_v20 = vstv %s579_s11  ;;  %s582_s17 = sld [smem:[#allocation8 + $0x9]]  ;;  %p725_p12 = scmp.ne.s32.totalorder %s443_s24, %s724_s10 }
  0x6f   : > { %v668_v21 = vpop.eup %667  ;;  %v409_v22 = vmul.f32 %v408_v20, %v939_v0  ;;  %v411_v23 = vstv %s580_s12  ;;  %s797_s11 = smov [#allocation9]  }
  0x70   : > { %v345_v24 = vmul.f32 %v668_v21, %v344_v16  ;;  %v401_v25 = vadd.f32 %v400_v17, %v398_v19  ;;  %v412_v26 = vmul.f32 %v941_v1, %v411_v23  ;;  %v415_v28 = vstv %s581_s13  ;;  %p726_p3 = pnand %p725_p12, %p1051_p2  ;;  %s728_s12 = sshll.u32 %s797_s11, 4  ;;  %s729_s12 = int_to_ptr.vmem [resolvable:$false] %s728_s12 }
  0x71   : > { %v374_v34 = vstv %s570_s14  ;;  %s730_s4 = scalar_lea.vmem %s729_s12, 128  ;;  %p731_p9 = scmp.lt.s32.totalorder %s443_s24, %s729_s12 }
  0x72   : > { %v346_v29 = vadd.f32 %v345_v24, %v331_v18  ;;  %675 = vtanh.f32 %v401_v25  ;;  %v413_v30 = vadd.f32 %v412_v26, %v409_v22  ;;  %v389_v37 = vstv %s574_s15  ;;  %p727_p4 = pneg %p726_p3  ;;  %p732_p7 = scmp.lt.s32.totalorder %s730_s4, %s724_s10 }
  0x73   : > { %v670_v31 = vpop.eup %669  ;;  %v404_v40 = vstv %s578_s16 }
  0x74   : > { %v360_v32 = vmul.f32 %v670_v31, %v359_v27  ;;  %v416_v33 = vadd.f32 %v415_v28, %v413_v30  ;;  %v419_v44 = vstv %s582_s17  ;;  %p733_p5 = por %p732_p7, %p731_p9 }
  0x76   : > { %v361_v35 = vadd.f32 %v360_v32, %v346_v29  ;;  %677 = vtanh.f32 %v416_v33  ;;  %p734_p6 = pnand %p733_p5, %p727_p4 }
  0x77   : > { %v672_v0 = vpop.eup %671 }
  0x78   : > { %v375_v36 = vmul.f32 %v672_v0, %v374_v34 }
  0x7a   : > { %v376_v1 = vadd.f32 %v375_v36, %v361_v35 }
  0x7b   : > { %v674_v38 = vpop.eup %673 }
  0x7c   : > { %v390_v39 = vmul.f32 %v674_v38, %v389_v37 }
  0x7e   : > { %v391_v41 = vadd.f32 %v390_v39, %v376_v1 }
  0x7f   : > { %v676_v42 = vpop.eup %675 }
  0x80   : > { %v405_v43 = vmul.f32 %v676_v42, %v404_v40 }
  0x82   : > { %v406_v46 = vadd.f32 %v405_v43, %v391_v41 }
  0x83   : > { %v678_v47 = vpop.eup %677 }
  0x84   : > { %v420_v48 = vmul.f32 %v678_v47, %v419_v44 }
  0x86   : > { %v421_v49 = vadd.f32 %v420_v48, %v406_v46 }
  0x88   : > { %426 = vst.msk [vmem:[%s258_s27] sm:$0xf] %vm424_vm0, %v421_v49 }
  0x89   : > { %737 = shalt.err (!%p734_p6)
}
  0x8a   : > { %s738_s13 = scalar_lea.hbm %s440_s6, 64  ;;  %s742_s16 = scalar_lea.hbm %s1038_s5, 128 }
  0x8b   : > { %p739_p10 = scmp.ne.s32.totalorder %s440_s6, %s738_s13  ;;  %p743_p11 = scmp.lt.s32.totalorder %s440_s6, %s1038_s5 }
  0x8c   : > { %p744_p13 = scmp.lt.s32.totalorder %s742_s16, %s738_s13 }
  0x8d   : > { %p740_p8 = pnand %p739_p10, %p1051_p2 }
  0x8e   : > { %p745_p1 = por %p744_p13, %p743_p11 }
  0x8f   : > { %p741_p0 = pneg %p740_p8 }
  0x91   : > { %p746_p12 = pnand %p745_p1, %p741_p0 }
  0x93   : > { %749 = shalt.err (!%p746_p12)
}
  0x94   : > { %601 = dma.vmem_to_hbm [thread:$0]  (%p1051_p2), %s443_s24, 64, %s440_s6, %s428_s9  }
  0x95 PF: > { %p623_p3 = scmp.ge.s32.totalorder %s792_s23, 2  ;;  %s454_s19 = sand.u32 1, %s780_s20  }
  0x96   : > { %p1052_p4 = scmp.ne.s32.totalorder %s1043_s30, 0  ;;  %s455_s26 = scalar_lea.sflag [#allocation4], %s454_s19 }
  0x98   : > { %p614_p9 = pnand %p623_p3, %p1052_p4 }
  0x9a   : > { %p615_p7 = pneg %p614_p9 }
  0x9c   : > { %775 = dma.done.wait (%p615_p7), %s455_s26, 64  }
  0x9d   : > { %777 = vsyncadd (%p615_p7), %s455_s26, 4294967232  ;;  %p18_p5 = scmp.ge.s32.totalorder %s856_s25, 4   ;;  %s1053_s20 = smov %s784_s21 }
  0x9e   : > { %s1054_s21 = smov %s788_s22  ;;  %s1055_s22 = smov %s867_s28 }
  0x9f   : > { %s1056_s23 = smov %s856_s25  ;;  %20 = sbr.rel (!%p18_p5) target bundleno = 7 (0x7), region = 89 }
  0xa4   :  { %460 = vsyncpa [#allocation4], 1 }
  0xa5   :  { %462 = vsyncpa [#allocation4 + $0x1], 1 }
  0xa6   :  { %463 = vsyncpa [#allocation5], 1 }
  0xa7   :  { %465 = vsyncpa [#allocation5 + $0x1], 1 }
  0xa8   :  { %466 = vsyncpa [#allocation7], 1 }

</bundles_post_ra>
